<compile_context>
chip_gen: v7x
topology: tpu7x:2x2x1
jax: 0.10.0
libtpu: 0.0.40
codegen_flags: <defaults>
</compile_context>

<pallas_src>
import functools

import jax
import jax.numpy as jnp
from jax.experimental import pallas as pl
from jax.experimental.pallas import tpu as pltpu


def prepare_params(attn_features, attn_height, wc, bc, *,
                   use_attn_features=True, use_attn_height=True,
                   slices=15, stream_dtype=jnp.bfloat16):
    """One-time (per weight update) prep — NOT in the per-call hot path.

    * sigmoid(attn_features) is a per-K-channel gate -> folded into the collapse
      weight once (kills the [1, K] attn stream + its in-kernel multiply).
    * sigmoid(attn_height)/S is the per-slice gate fused with the AvgPool1d
      scale (tiny [S, 1] vector consumed by the kernel epilogue).
    * Collapse weight streamed as bf16 (f32 accumulation in the MXU).
    """
    n_out, Cf, H, W = wc.shape
    K = Cf * H * W
    wc_f32 = wc.astype(jnp.float32)
    if use_attn_features:
        wc_f32 = wc_f32 * jax.nn.sigmoid(attn_features.astype(jnp.float32))
    wc2d = wc_f32.reshape(n_out, K).astype(stream_dtype)
    if use_attn_height:
        gate = jax.nn.sigmoid(attn_height.reshape(slices, 1).astype(jnp.float32))
    else:
        gate = jnp.ones((slices, 1), jnp.float32)
    gate = gate / float(slices)                       # fuse AvgPool1d's 1/S
    bc_row = bc.reshape(1, n_out).astype(jnp.float32)
    return wc2d, gate, bc_row


def _body_kernel(feat_ref, wc_ref, gate_ref, out_ref, acc_ref):
    # feat_ref: [S, Kb]  wc_ref: [n_out, Kb]  gate_ref: [S, 1]
    # out_ref:  [1, 1, n_out] per-core partial   acc_ref: [S, n_out] scratch
    j = pl.program_id(1)

    @pl.when(j == 0)
    def _init():
        acc_ref[...] = jnp.zeros_like(acc_ref)

    # conv_collapse partial sum over this K block: [S, Kb] x [n_out, Kb]^T.
    acc_ref[...] += jax.lax.dot_general(
        feat_ref[...], wc_ref[...],
        dimension_numbers=(((1,), (1,)), ((), ())),
        preferred_element_type=jnp.float32)

    @pl.when(j == pl.num_programs(1) - 1)
    def _finalize():
        # Per-slice gate (already includes 1/S) + slice pooling as a VPU/XLU
        # reduction — avoids a degenerate 1x15x4 MXU push/pop in the epilogue.
        pooled = jnp.sum(gate_ref[...] * acc_ref[...], axis=0, keepdims=True)
        out_ref[...] = pooled.reshape(out_ref.shape)


@functools.partial(jax.jit, static_argnames=("block_k",))
def body_cll_avg_hfweight(feat, wc2d, gate, bc_row, *, block_k=None):
    """feat: [S, Cf, H, W] (bf16 recommended — backbone output dtype);
    wc2d/gate/bc_row from prepare_params().  Returns [1, n_out] f32."""
    S, Cf, H, W = feat.shape
    K = Cf * H * W
    n_out = wc2d.shape[0]

    feat2d = feat.reshape(S, K)                       # contiguous view, no copy

    # Leading 2-way K split (v7x: one half per TensorCore), then the biggest
    # lane-aligned block per half under the cap.  Cap 50176 => ResNet18 K runs
    # as 1 block per core (2 sequential steps on single-core v5e/v6e), no pad.
    _CAP = 50176
    k_half = pl.cdiv(K, 2)
    if block_k is None:
        nk = pl.cdiv(k_half, _CAP)
        block_k = pl.cdiv(pl.cdiv(k_half, nk), 128) * 128
    else:
        assert block_k % 128 == 0, "block_k must be a multiple of 128"
        nk = pl.cdiv(k_half, block_k)
    kp = 2 * nk * block_k
    if kp != K:
        # Exact fallback (zero feat columns pair with zero weight columns).
        # Dead for the ResNet18 shape and the default demo tiling.
        pad = ((0, 0), (0, kp - K))
        feat2d = jnp.pad(feat2d, pad)
        wc2d = jnp.pad(wc2d, pad)

    k_map = lambda c, j: (0, c * nk + j)
    grid_spec = pltpu.PrefetchScalarGridSpec(
        num_scalar_prefetch=0,
        grid=(2, nk),                                 # (core split, K reduction)
        in_specs=[
            pl.BlockSpec((S, block_k), k_map),        # feature block (bf16/f32)
            pl.BlockSpec((n_out, block_k), k_map),    # af-folded collapse weight
            pl.BlockSpec((S, 1), lambda c, j: (0, 0)),  # sigmoid(ah)/S gate
        ],
        out_specs=pl.BlockSpec((1, 1, n_out), lambda c, j: (c, 0, 0)),
        scratch_shapes=[pltpu.VMEM((S, n_out), jnp.float32)],
    )

    feat_bytes = feat2d.size * feat2d.dtype.itemsize
    wc_bytes = wc2d.size * wc2d.dtype.itemsize
    cost = pl.CostEstimate(
        flops=2 * S * kp * n_out + 2 * S * n_out,
        transcendentals=0,                            # sigmoids folded in prep
        bytes_accessed=feat_bytes + wc_bytes + 4 * (S + 2 * n_out),
    )

    partials = pl.pallas_call(
        _body_kernel,
        out_shape=jax.ShapeDtypeStruct((2, 1, n_out), jnp.float32),
        grid_spec=grid_spec,
        compiler_params=pltpu.CompilerParams(
            dimension_semantics=("parallel", "arbitrary"),
            vmem_limit_bytes=32 * 1024 * 1024,        # raise v5e's 16 MiB default
        ),
        cost_estimate=cost,
    )(feat2d, wc2d, gate)

    # Combine the two per-core partials; the conv bias commutes with the slice
    # average, so adding it once here is exact.
    return jnp.sum(partials, axis=0) + bc_row


def _reference(feat, attn_features, attn_height, wc, bc,
               use_attn_features=True, use_attn_height=True):
    """Pure-JAX f32 mirror of the PyTorch semantics (post-backbone)."""
    x = feat.astype(jnp.float32)
    if use_attn_features:
        x = x * jax.nn.sigmoid(attn_features)                    # [1,Cf,1,1]
    if use_attn_height:
        x = x * jax.nn.sigmoid(attn_height)                      # [S,1,1,1]
    y = jnp.einsum("schw,ochw->so", x, wc) + bc.reshape(1, -1)   # conv_collapse
    return y.mean(axis=0, keepdims=True)                         # AvgPool1d over S


if __name__ == "__main__":
    S = 15                      # self.slices (fixed by the module)
    Cf, H, W = 64, 14, 14       # small stand-in for ResNet18's [512, 14, 14]
    n_outputs = 4

    key = jax.random.PRNGKey(0)
    k_feat, k_af, k_ah, k_wc, k_bc = jax.random.split(key, 5)

    # Backbone output streamed in bf16 (producer dtype); f32 also works.
    feat = jax.random.normal(k_feat, (S, Cf, H, W), jnp.float32).astype(jnp.bfloat16)
    attn_features = jax.random.normal(k_af, (1, Cf, 1, 1), jnp.float32)
    attn_height = jax.random.normal(k_ah, (S, 1, 1, 1), jnp.float32)
    wc = 0.02 * jax.random.normal(k_wc, (n_outputs, Cf, H, W), jnp.float32)
    bc = 0.1 * jax.random.normal(k_bc, (n_outputs,), jnp.float32)

    # One-time weight prep (outside the per-call hot path).
    wc2d, gate, bc_row = prepare_params(attn_features, attn_height, wc, bc,
                                        use_attn_features=True,
                                        use_attn_height=True, slices=S)

    ref = _reference(feat, attn_features, attn_height, wc, bc)

    # Production path: one K block per core (2-step grid, no padding).
    out = jax.block_until_ready(body_cll_avg_hfweight(feat, wc2d, gate, bc_row))
    assert out.shape == (1, n_outputs), out.shape
    assert jnp.allclose(out, ref, rtol=1e-2, atol=2e-3), (out, ref)

    # Small block_k: exercises the multi-step pipelined reduction and the exact
    # zero-pad fallback (correctness coverage only; not the production tiling).
    out2 = jax.block_until_ready(
        body_cll_avg_hfweight(feat, wc2d, gate, bc_row, block_k=1792))
    assert jnp.allclose(out2, ref, rtol=1e-2, atol=2e-3), (out2, ref)

    print("KERNEL_OK")
</pallas_src>

<mosaic_0001>
module attributes {stable_mosaic.version = 11 : i64} {
  func.func @_body_kernel(%arg0: i32, %arg1: i32, %arg2: memref<15x6272xbf16, #tpu.memory_space<vmem>>, %arg3: memref<4x6272xbf16, #tpu.memory_space<vmem>>, %arg4: memref<15x1xf32, #tpu.memory_space<vmem>>, %arg5: memref<1x1x4xf32, #tpu.memory_space<vmem>>, %arg6: memref<15x4xf32, #tpu.memory_space<vmem>>) attributes {dimension_semantics = [#tpu.dimension_semantics<parallel>, #tpu.dimension_semantics<arbitrary>], iteration_bounds = array<i64: 2, 1>, scalar_prefetch = 0 : i64, scratch_operands = 1 : i64, tpu.core_type = #tpu.core_type<tc>, window_params = [{transform_indices = @transform_0, window_bounds = array<i64: 15, 6272>}, {transform_indices = @transform_1, window_bounds = array<i64: 4, 6272>}, {pipeline_mode = #tpu.pipeline_mode<synchronous>, transform_indices = @transform_2, window_bounds = array<i64: 15, 1>}, {transform_indices = @transform_3, window_bounds = array<i64: 1, 1, 4>}]} {
    %c0_i32 = arith.constant 0 : i32
    %0 = arith.cmpi eq, %arg1, %c0_i32 : i32
    %1 = arith.extui %0 : i1 to i32
    %c0_i32_0 = arith.constant 0 : i32
    %2 = arith.cmpi ne, %1, %c0_i32_0 : i32
    scf.if %2 {
      %cst_10 = arith.constant 0.000000e+00 : f32
      %12 = vector.broadcast %cst_10 : f32 to vector<15x4xf32>
      %c0_11 = arith.constant 0 : index
      %c0_12 = arith.constant 0 : index
      %13 = vector.load %arg6[%c0_11, %c0_12] : memref<15x4xf32, #tpu.memory_space<vmem>>, vector<15x4xf32>
      tpu.vector_store %arg6[%c0_11, %c0_12], %12 {strides = array<i32>} : memref<15x4xf32, #tpu.memory_space<vmem>>, vector<15x4xf32>,
    } else {
    }
    %c0 = arith.constant 0 : index
    %c0_1 = arith.constant 0 : index
    %3 = vector.load %arg6[%c0, %c0_1] : memref<15x4xf32, #tpu.memory_space<vmem>>, vector<15x4xf32>
    %c0_2 = arith.constant 0 : index
    %c0_3 = arith.constant 0 : index
    %4 = vector.load %arg2[%c0_2, %c0_3] : memref<15x6272xbf16, #tpu.memory_space<vmem>>, vector<15x6272xbf16>
    %c0_4 = arith.constant 0 : index
    %c0_5 = arith.constant 0 : index
    %5 = vector.load %arg3[%c0_4, %c0_5] : memref<4x6272xbf16, #tpu.memory_space<vmem>>, vector<4x6272xbf16>
    %cst = arith.constant dense<0.000000e+00> : vector<15x4xf32>
    %6 = tpu.matmul %4, %5, %cst {dimension_numbers = #tpu.dot_dimension_numbers<[1], [1], [0], [0], [0, 0, 1, 0], [], []>} : vector<15x6272xbf16>, vector<4x6272xbf16>, vector<15x4xf32> -> vector<15x4xf32>
    %7 = arith.addf %3, %6 : vector<15x4xf32>
    %c0_6 = arith.constant 0 : index
    %c0_7 = arith.constant 0 : index
    %8 = vector.load %arg6[%c0_6, %c0_7] : memref<15x4xf32, #tpu.memory_space<vmem>>, vector<15x4xf32>
    tpu.vector_store %arg6[%c0_6, %c0_7], %7 {strides = array<i32>} : memref<15x4xf32, #tpu.memory_space<vmem>>, vector<15x4xf32>,
    %c0_i32_8 = arith.constant 0 : i32
    %9 = arith.cmpi eq, %arg1, %c0_i32_8 : i32
    %10 = arith.extui %9 : i1 to i32
    %c0_i32_9 = arith.constant 0 : i32
    %11 = arith.cmpi ne, %10, %c0_i32_9 : i32
    scf.if %11 {
      %c0_10 = arith.constant 0 : index
      %c0_11 = arith.constant 0 : index
      %12 = vector.load %arg4[%c0_10, %c0_11] : memref<15x1xf32, #tpu.memory_space<vmem>>, vector<15x1xf32>
      %c0_12 = arith.constant 0 : index
      %c0_13 = arith.constant 0 : index
      %13 = vector.load %arg6[%c0_12, %c0_13] : memref<15x4xf32, #tpu.memory_space<vmem>>, vector<15x4xf32>
      %14 = vector.broadcast %12 : vector<15x1xf32> to vector<15x4xf32>
      %15 = arith.mulf %14, %13 : vector<15x4xf32>
      %cst_14 = arith.constant dense<0.000000e+00> : vector<4xf32>
      %16 = vector.multi_reduction <add>, %15, %cst_14 [0] : vector<15x4xf32> to vector<4xf32>
      %17 = vector.shape_cast %16 : vector<4xf32> to vector<1x4xf32>
      %18 = vector.shape_cast %17 : vector<1x4xf32> to vector<1x1x4xf32>
      %c0_15 = arith.constant 0 : index
      %c0_16 = arith.constant 0 : index
      %c0_17 = arith.constant 0 : index
      %19 = vector.load %arg5[%c0_15, %c0_16, %c0_17] : memref<1x1x4xf32, #tpu.memory_space<vmem>>, vector<1x1x4xf32>
      tpu.vector_store %arg5[%c0_15, %c0_16, %c0_17], %18 {strides = array<i32>} : memref<1x1x4xf32, #tpu.memory_space<vmem>>, vector<1x1x4xf32>,
    } else {
    }
    return
  }
  func.func @transform_0(%arg0: i32, %arg1: i32) -> (i32, i32) {
    %c1_i32 = arith.constant 1 : i32
    %0 = arith.muli %arg0, %c1_i32 : i32
    %1 = arith.addi %0, %arg1 : i32
    %c0_i32 = arith.constant 0 : i32
    %c0_i32_0 = arith.constant 0 : i32
    return %c0_i32, %1 : i32, i32
  }
  func.func @transform_1(%arg0: i32, %arg1: i32) -> (i32, i32) {
    %c1_i32 = arith.constant 1 : i32
    %0 = arith.muli %arg0, %c1_i32 : i32
    %1 = arith.addi %0, %arg1 : i32
    %c0_i32 = arith.constant 0 : i32
    %c0_i32_0 = arith.constant 0 : i32
    return %c0_i32, %1 : i32, i32
  }
  func.func @transform_2(%arg0: i32, %arg1: i32) -> (i32, i32) {
    %c0_i32 = arith.constant 0 : i32
    %c0_i32_0 = arith.constant 0 : i32
    %c0_i32_1 = arith.constant 0 : i32
    return %c0_i32, %c0_i32_0 : i32, i32
  }
  func.func @transform_3(%arg0: i32, %arg1: i32) -> (i32, i32, i32) {
    %c0_i32 = arith.constant 0 : i32
    %c0_i32_0 = arith.constant 0 : i32
    %c0_i32_1 = arith.constant 0 : i32
    return %arg0, %c0_i32, %c0_i32_0 : i32, i32, i32
  }
}

</mosaic_0001>

<bundles_post_ra>
// kernel: body_cll_avg_hfweight.1
= control target key start
LH: loop header
LB: loop body
LE: loop exit
PB: predicated region body
PF: predicated region fallthrough
CT: control target
= control target key end

     0   :  { %s2340_s12 = smov 0   ;;  %s2342_s13 = smov 0   ;;  %s2648_s0 = inlined_call_operand.vmem [shape: bf16[15,12544], index: 0, kind: input, shape index: {}]   ;;  %s2649_s1 = inlined_call_operand.vmem [shape: bf16[4,12544], index: 1, kind: input, shape index: {}]   ;;  %s2650_s2 = inlined_call_operand.vmem [shape: f32[15,1], index: 2, kind: input, shape index: {}]   ;;  %s2651_s3 = inlined_call_operand.vmem [shape: f32[2,1,4], index: 3, kind: output, shape index: {}]  }
   0x1   :  { %s2344_s14 = smov 0   ;;  %s2346_s15 = smov 0  }
   0x2   :  { %s2348_s16 = smov 0  }
   0x3 LB: > { %s25_s17 = sadd.s32 1, %s2310_s15  ;;  %p41_p1 = scmp.ne.s32.totalorder %s2302_s13, %s2298_s12  ;;  %s2314_s16 = sphi %s2348_s16, %s13_s16   ;;  %s2310_s15 = sphi %s2346_s15, %s2655_s15   ;;  %s2306_s14 = sphi %s2344_s14, %s2654_s14   ;;  %s2302_s13 = sphi %s2342_s13, %s2653_s13   ;;  %s2298_s12 = sphi %s2340_s12, %s2652_s12  }
   0x4   : > { %p27_p0 = scmp.ge.s32.totalorder %s25_s17, 2  ;;  %p42_p2 = scmp.eq.s32.totalorder %s2314_s16, 0 }
   0x5   : > { %s34_s19 = sadd.s32 1, %s2302_s13  ;;  %p2075_p5 = scmp.ge.s32.totalorder %s2314_s16, 2 }
   0x6   : > { %s2657_s17 = smov (%p27_p0, %s25_s17), 0  ;;  %p43_p3 = por %p42_p2, %p41_p1 }
   0x7   : > { %s31_s18 = ssub.s32 %s2310_s15, %s2657_s17  ;;  %145 = sbr.rel (%p2075_p5) target bundleno = 44 (0x2c), region = 20 }
   0x8   : > { %p32_p4 = scmp.eq.s32.totalorder %s31_s18, 0 }
   0xa   : > { %s2375_s20 = scalar_select %p32_p4, %s2302_s13, %s34_s19  }
   0xe   : > { %148 = sbr.rel (!%p43_p3) target bundleno = 44 (0x2c), region = 24  ;;  %s150_s21 = sand.u32 (%p43_p3), 1, %s2302_s13  }
   0xf   : > { %s2135_s22 = smul.u32 (%p43_p3), 196, %s2310_s15 }
  0x10   : > { %s2144_s23 = smul.u32 (%p43_p3), 392, %s150_s21 }
  0x11   : > { %s2383_s26 = scalar_lea.vmem (%p43_p3), %s2648_s0, %s2135_s22 }
  0x12   : > { %v171_v0 = vld [vmem:[%s2383_s26] sm:$0xff] (%p43_p3)  ;;  %v173_v1 = vld [vmem:[%s2383_s26 + $0x8] sm:$0xff] (%p43_p3)  ;;  %v175_v2 = vld [vmem:[%s2383_s26 + $0x10] sm:$0xff] (%p43_p3)  ;;  %s2388_s27 = scalar_lea.vmem (%p43_p3), [#allocation3], %s2144_s23 }
  0x13   : > { %172 = vst [vmem:[%s2388_s27] sm:$0xff] (%p43_p3), %v171_v0  ;;  %174 = vst [vmem:[%s2388_s27 + $0x8] sm:$0xff] (%p43_p3), %v173_v1  ;;  %v177_v3 = vld [vmem:[%s2383_s26 + $0x18] sm:$0xff] (%p43_p3)  ;;  %v179_v4 = vld [vmem:[%s2383_s26 + $0x20] sm:$0xff] (%p43_p3) }
  0x14   : > { %176 = vst [vmem:[%s2388_s27 + $0x10] sm:$0xff] (%p43_p3), %v175_v2  ;;  %v181_v5 = vld [vmem:[%s2383_s26 + $0x28] sm:$0xff] (%p43_p3)  ;;  %178 = vst [vmem:[%s2388_s27 + $0x18] sm:$0xff] (%p43_p3), %v177_v3  ;;  %v183_v6 = vld [vmem:[%s2383_s26 + $0x30] sm:$0xff] (%p43_p3) }
  0x15   : > { %180 = vst [vmem:[%s2388_s27 + $0x20] sm:$0xff] %v179_v4  ;;  %182 = vst [vmem:[%s2388_s27 + $0x28] sm:$0xff] %v181_v5  ;;  %v185_v7 = vld [vmem:[%s2383_s26 + $0x38] sm:$0xff]  ;;  %v187_v8 = vld [vmem:[%s2383_s26 + $0x40] sm:$0xff] }
  0x16   : > { %184 = vst [vmem:[%s2388_s27 + $0x30] sm:$0xff] %v183_v6  ;;  %186 = vst [vmem:[%s2388_s27 + $0x38] sm:$0xff] %v185_v7  ;;  %v189_v9 = vld [vmem:[%s2383_s26 + $0x48] sm:$0xff]  ;;  %v191_v10 = vld [vmem:[%s2383_s26 + $0x50] sm:$0xff] }
  0x17   : > { %188 = vst [vmem:[%s2388_s27 + $0x40] sm:$0xff] %v187_v8  ;;  %v193_v11 = vld [vmem:[%s2383_s26 + $0x58] sm:$0xff]  ;;  %190 = vst [vmem:[%s2388_s27 + $0x48] sm:$0xff] %v189_v9  ;;  %v195_v12 = vld [vmem:[%s2383_s26 + $0x60] sm:$0xff] }
  0x18   : > { %192 = vst [vmem:[%s2388_s27 + $0x50] sm:$0xff] %v191_v10  ;;  %194 = vst [vmem:[%s2388_s27 + $0x58] sm:$0xff] %v193_v11  ;;  %v197_v13 = vld [vmem:[%s2383_s26 + $0x68] sm:$0xff]  ;;  %v199_v14 = vld [vmem:[%s2383_s26 + $0x70] sm:$0xff] }
  0x19   : > { %196 = vst [vmem:[%s2388_s27 + $0x60] sm:$0xff] %v195_v12  ;;  %198 = vst [vmem:[%s2388_s27 + $0x68] sm:$0xff] %v197_v13  ;;  %v201_v15 = vld [vmem:[%s2383_s26 + $0x78] sm:$0xff]  ;;  %v203_v16 = vld [vmem:[%s2383_s26 + $0x80] sm:$0xff] }
  0x1a   : > { %200 = vst [vmem:[%s2388_s27 + $0x70] sm:$0xff] %v199_v14  ;;  %v205_v17 = vld [vmem:[%s2383_s26 + $0x88] sm:$0xff]  ;;  %202 = vst [vmem:[%s2388_s27 + $0x78] sm:$0xff] %v201_v15  ;;  %v207_v18 = vld [vmem:[%s2383_s26 + $0x90] sm:$0xff] }
  0x1b   : > { %204 = vst [vmem:[%s2388_s27 + $0x80] sm:$0xff] %v203_v16  ;;  %206 = vst [vmem:[%s2388_s27 + $0x88] sm:$0xff] %v205_v17  ;;  %v209_v19 = vld [vmem:[%s2383_s26 + $0x98] sm:$0xff]  ;;  %v211_v20 = vld [vmem:[%s2383_s26 + $0xa0] sm:$0xff] }
  0x1c   : > { %208 = vst [vmem:[%s2388_s27 + $0x90] sm:$0xff] %v207_v18  ;;  %210 = vst [vmem:[%s2388_s27 + $0x98] sm:$0xff] %v209_v19  ;;  %v213_v21 = vld [vmem:[%s2383_s26 + $0xa8] sm:$0xff]  ;;  %v215_v22 = vld [vmem:[%s2383_s26 + $0xb0] sm:$0xff] }
  0x1d   : > { %212 = vst [vmem:[%s2388_s27 + $0xa0] sm:$0xff] %v211_v20  ;;  %v217_v23 = vld [vmem:[%s2383_s26 + $0xb8] sm:$0xff]  ;;  %214 = vst [vmem:[%s2388_s27 + $0xa8] sm:$0xff] %v213_v21  ;;  %v219_v24 = vld [vmem:[%s2383_s26 + $0x188] sm:$0xff] }
  0x1e   : > { %216 = vst [vmem:[%s2388_s27 + $0xb0] sm:$0xff] %v215_v22  ;;  %218 = vst [vmem:[%s2388_s27 + $0xb8] sm:$0xff] %v217_v23  ;;  %v221_v25 = vld [vmem:[%s2383_s26 + $0x190] sm:$0xff]  ;;  %v223_v26 = vld [vmem:[%s2383_s26 + $0x198] sm:$0xff] }
  0x1f   : > { %220 = vst [vmem:[%s2388_s27 + $0xc4] sm:$0xff] %v219_v24  ;;  %222 = vst [vmem:[%s2388_s27 + $0xcc] sm:$0xff] %v221_v25  ;;  %v225_v27 = vld [vmem:[%s2383_s26 + $0x1a0] sm:$0xff]  ;;  %v227_v28 = vld [vmem:[%s2383_s26 + $0x1a8] sm:$0xff] }
  0x20   : > { %224 = vst [vmem:[%s2388_s27 + $0xd4] sm:$0xff] %v223_v26  ;;  %v229_v29 = vld [vmem:[%s2383_s26 + $0x1b0] sm:$0xff]  ;;  %226 = vst [vmem:[%s2388_s27 + $0xdc] sm:$0xff] %v225_v27  ;;  %v231_v30 = vld [vmem:[%s2383_s26 + $0x1b8] sm:$0xff] }
  0x21   : > { %228 = vst [vmem:[%s2388_s27 + $0xe4] sm:$0xff] %v227_v28  ;;  %230 = vst [vmem:[%s2388_s27 + $0xec] sm:$0xff] %v229_v29  ;;  %v233_v31 = vld [vmem:[%s2383_s26 + $0x1c0] sm:$0xff]  ;;  %v235_v32 = vld [vmem:[%s2383_s26 + $0x1c8] sm:$0xff] }
  0x22   : > { %232 = vst [vmem:[%s2388_s27 + $0xf4] sm:$0xff] %v231_v30  ;;  %234 = vst [vmem:[%s2388_s27 + $0xfc] sm:$0xff] %v233_v31  ;;  %v237_v33 = vld [vmem:[%s2383_s26 + $0x1d0] sm:$0xff]  ;;  %v239_v34 = vld [vmem:[%s2383_s26 + $0x1d8] sm:$0xff] }
  0x23   : > { %236 = vst [vmem:[%s2388_s27 + $0x104] sm:$0xff] %v235_v32  ;;  %v241_v35 = vld [vmem:[%s2383_s26 + $0x1e0] sm:$0xff]  ;;  %238 = vst [vmem:[%s2388_s27 + $0x10c] sm:$0xff] %v237_v33  ;;  %v243_v36 = vld [vmem:[%s2383_s26 + $0x1e8] sm:$0xff] }
  0x24   : > { %240 = vst [vmem:[%s2388_s27 + $0x114] sm:$0xff] %v239_v34  ;;  %242 = vst [vmem:[%s2388_s27 + $0x11c] sm:$0xff] %v241_v35  ;;  %v245_v37 = vld [vmem:[%s2383_s26 + $0x1f0] sm:$0xff]  ;;  %v247_v38 = vld [vmem:[%s2383_s26 + $0x1f8] sm:$0xff] }
  0x25   : > { %244 = vst [vmem:[%s2388_s27 + $0x124] sm:$0xff] %v243_v36  ;;  %246 = vst [vmem:[%s2388_s27 + $0x12c] sm:$0xff] %v245_v37  ;;  %v249_v39 = vld [vmem:[%s2383_s26 + $0x200] sm:$0xff]  ;;  %v251_v40 = vld [vmem:[%s2383_s26 + $0x208] sm:$0xff] }
  0x26   : > { %248 = vst [vmem:[%s2388_s27 + $0x134] sm:$0xff] %v247_v38  ;;  %v253_v41 = vld [vmem:[%s2383_s26 + $0x210] sm:$0xff]  ;;  %250 = vst [vmem:[%s2388_s27 + $0x13c] sm:$0xff] %v249_v39  ;;  %v255_v42 = vld [vmem:[%s2383_s26 + $0x218] sm:$0xff] }
  0x27   : > { %252 = vst [vmem:[%s2388_s27 + $0x144] sm:$0xff] %v251_v40  ;;  %254 = vst [vmem:[%s2388_s27 + $0x14c] sm:$0xff] %v253_v41  ;;  %v257_v43 = vld [vmem:[%s2383_s26 + $0x220] sm:$0xff]  ;;  %v259_v44 = vld [vmem:[%s2383_s26 + $0x228] sm:$0xff] }
  0x28   : > { %256 = vst [vmem:[%s2388_s27 + $0x154] sm:$0xff] %v255_v42  ;;  %258 = vst [vmem:[%s2388_s27 + $0x15c] sm:$0xff] %v257_v43  ;;  %v261_v45 = vld [vmem:[%s2383_s26 + $0x230] sm:$0xff]  ;;  %v263_v46 = vld [vmem:[%s2383_s26 + $0x238] sm:$0xff] }
  0x29   : > { %260 = vst [vmem:[%s2388_s27 + $0x164] sm:$0xff] %v259_v44  ;;  %v265_v47 = vld [vmem:[%s2383_s26 + $0x240] sm:$0xff]  ;;  %262 = vst [vmem:[%s2388_s27 + $0x16c] sm:$0xff] %v261_v45  ;;  %v2079_v49 = vld [vmem:[%s2383_s26 + $0x248] sm:$0xf] }
  0x2a   : > { %264 = vst [vmem:[%s2388_s27 + $0x174] sm:$0xff] %v263_v46  ;;  %266 = vst [vmem:[%s2388_s27 + $0x17c] sm:$0xff] %v265_v47  ;;  %v2077_v48 = vld [vmem:[%s2383_s26 + $0xc0] sm:$0xf] }
  0x2b   : > { %2078 = vst [vmem:[%s2388_s27 + $0xc0] sm:$0xf] %v2077_v48  ;;  %2080 = vst [vmem:[%s2388_s27 + $0x184] sm:$0xf] %v2079_v49 }
  0x2c PF: > { %p2081_p6 = scmp.ge.s32.totalorder %s2314_s16, 1  ;;  %p293_p7 = scmp.lt.s32.totalorder %s2314_s16, 3 }
  0x2e   : > { %p294_p8 = pnand %p2081_p6, %p293_p7 }
  0x2f   : > { %s330_s28 = smul.u32 (!%p294_p8), 49, %s2306_s14  ;;  %v677_v50 = vlaneseq (!%p294_p8)  ;;  %s300_s29 = sand.u32 (!%p294_p8), 1, %s2298_s12   ;;  %v2316_v51 = vmov (!%p294_p8), 1983009808   ;;  %v1967_v53 = vld [vmem:[%s2650_s2] sm:$0xff] (!%p294_p8)  ;;  %v2317_v55 = vmov (!%p294_p8), 0  }
  0x30   : > { %297 = sbr.rel (%p294_p8) target bundleno = 411 (0x19b), region = 54  ;;  %v675_v52 = vunpack.c.l.s4 (!%p294_p8), %v2316_v51  ;;  %2190 = vset.pattern.permute.xlu0 (!%p294_p8), %v2317_v55  ;;  %v1968_v57 = vld [vmem:[%s2650_s2 + $0x8] sm:$0x7f] (!%p294_p8)  ;;  %vm2319_vm0 = vmmov (!%p294_p8), 0   ;;  %vm345_vm1 = vcmask (!%p294_p8), 31744   ;;  %vm347_vm2 = vcmask (!%p294_p8), 30720  }
  0x31   : > { %s2145_s30 = smul.u32 (!%p294_p8), 392, %s300_s29  ;;  %p331_p9 = scmp.lt.s32.totalorder (!%p294_p8), %s330_s28, 97  ;;  %v678_v54 = vshrl.u32 (!%p294_p8), %v677_v50, 7  ;;  %1973 = vperm.xlu0 (!%p294_p8), %2190, %v1967_v53   ;;  %vm1992_vm3 = vcmask (!%p294_p8), 24576  }
  0x32   : > { %v676_v56 = vunpack.c.0.s8 (!%p294_p8), %v675_v52  ;;  %p337_p10 = scmp.lt.s32.totalorder (!%p294_p8), %s2306_s14, 1 }
  0x33   : > { %s2494_s6 = scalar_lea.vmem (!%p294_p8), [#allocation3], %s2145_s30 }
  0x34   : > { %v2499_v58 = vsub.s32 (!%p294_p8), %v676_v56, %v678_v54  ;;  %v2194_v59 = vld [vmem:[%s2494_s6 + $0x4] ss:$196 sps:$4 sm:$0xff] (!%p294_p8)   ;;  %v2197_v60 = vld [vmem:[%s2494_s6 + $0xc] ss:$196 sps:$4 sm:$0xff] (!%p294_p8)   ;;  %v2201_v13 = vld [vmem:[%s2494_s6 + $0x14] ss:$196 sps:$4 sm:$0xff] (!%p294_p8)  }
  0x35   : > { %965 = vmatprep.mubr.bf16.mxu0 (!%p294_p8), %v2194_v59  ;;  %1978 = vperm.xlu0 (!%p294_p8), %2190, %v1968_v57   ;;  %v2192_v12 = vld [vmem:[%s2494_s6] ss:$196 sps:$4 sm:$0xff] (!%p294_p8)   ;;  %v2195_v16 = vld [vmem:[%s2494_s6 + $0x8] ss:$196 sps:$4 sm:$0xff] (!%p294_p8)   ;;  %v2199_v22 = vld [vmem:[%s2494_s6 + $0x10] ss:$196 sps:$4 sm:$0xff] (!%p294_p8)  }
  0x36   : > { %1006 = vmatprep.mubr.bf16.mxu1 (!%p294_p8), %v2197_v60  ;;  %v2204_v18 = vld [vmem:[%s2494_s6 + $0x1c] ss:$196 sps:$4 sm:$0xff] (!%p294_p8)   ;;  %v2208_v24 = vld [vmem:[%s2494_s6 + $0x24] ss:$196 sps:$4 sm:$0xff] (!%p294_p8)   ;;  %v2211_v28 = vld [vmem:[%s2494_s6 + $0x2c] ss:$196 sps:$4 sm:$0xff] (!%p294_p8)  }
  0x37   : > { %s2659_s28 = smov (!%p331_p9, %s330_s28), 97  ;;  %v2202_v26 = vld [vmem:[%s2494_s6 + $0x18] ss:$196 sps:$4 sm:$0xff]   ;;  %v2206_v35 = vld [vmem:[%s2494_s6 + $0x20] ss:$196 sps:$4 sm:$0xff]   ;;  %s2661_s14 = smov (!%p337_p10, %s2306_s14), 1 }
  0x38   : > { %s2082_s9 = sshll.u32 %s2659_s28, 1  ;;  %v2215_v38 = vld [vmem:[%s2494_s6 + $0x34] ss:$196 sps:$4 sm:$0xff]   ;;  %v2209_v43 = vld [vmem:[%s2494_s6 + $0x28] ss:$196 sps:$4 sm:$0xff]   ;;  %s339_s21 = scalar_lea.vmem %s2651_s3, %s2661_s14 }
  0x39   : > { %s2506_s12 = scalar_lea.vmem %s2649_s1, %s2082_s9  ;;  %v2218_v47 = vld [vmem:[%s2494_s6 + $0x3c] ss:$196 sps:$4 sm:$0xff]   ;;  %v2213_v54 = vld [vmem:[%s2494_s6 + $0x30] ss:$196 sps:$4 sm:$0xff]   ;;  %v2222_v56 = vld [vmem:[%s2494_s6 + $0x44] ss:$196 sps:$4 sm:$0xff]  }
  0x3a   : > { %v401_v61 = vld [vmem:[%s2506_s12] sm:$0xff]  ;;  %v402_v62 = vld [vmem:[%s2506_s12 + $0x8] sm:$0xff]  ;;  %v403_v3 = vld [vmem:[%s2506_s12 + $0x10] sm:$0xff] }
  0x3b   : > { %v680_v63 = vrot.slane %v401_v61, %v2499_v58  ;;  %v673_v0 = vcombine.high %v401_v61, %v401_v61  ;;  %v697_v1 = vrot.slane %v402_v62, %v2499_v58  ;;  %v690_v2 = vcombine.high %v402_v62, %v402_v62  ;;  %v404_v15 = vld [vmem:[%s2506_s12 + $0x18] sm:$0xff]  ;;  %v405_v25 = vld [vmem:[%s2506_s12 + $0x20] sm:$0xff]  ;;  %v410_v31 = vld [vmem:[%s2506_s12 + $0x48] sm:$0xff] }
  0x3c   : > { %v707_v10 = vcombine.high %v403_v3, %v403_v3  ;;  %v714_v11 = vrot.slane %v403_v3, %v2499_v58  ;;  %v724_v20 = vcombine.high %v404_v15, %v404_v15  ;;  %v731_v21 = vrot.slane %v404_v15, %v2499_v58  ;;  %v411_v37 = vld [vmem:[%s2506_s12 + $0x50] sm:$0xff]  ;;  %v406_v42 = vld [vmem:[%s2506_s12 + $0x28] sm:$0xff]  ;;  %v412_v46 = vld [vmem:[%s2506_s12 + $0x58] sm:$0xff] }
  0x3d   : > { %v688_v4 = vcombine.high %v680_v63, %v680_v63  ;;  %v687_v5 = vrot.slane %v673_v0, %v2499_v58  ;;  %v705_v6 = vcombine.high %v697_v1, %v697_v1  ;;  %v704_v7 = vrot.slane %v690_v2, %v2499_v58  ;;  %v407_v57 = vld [vmem:[%s2506_s12 + $0x30] sm:$0xff]  ;;  %v2225_v61 = vld [vmem:[%s2494_s6 + $0x4c] ss:$196 sps:$4 sm:$0xff]  }
  0x3e   : > { %v721_v14 = vrot.slane %v707_v10, %v2499_v58  ;;  %v722_v17 = vcombine.high %v714_v11, %v714_v11  ;;  %v738_v23 = vrot.slane %v724_v20, %v2499_v58  ;;  %v739_v27 = vcombine.high %v731_v21, %v731_v21  ;;  %v2216_v59 = vld [vmem:[%s2494_s6 + $0x38] ss:$196 sps:$4 sm:$0xff]  }
  0x3f   : > { %933 = vmatprep.subr.bf16.mxu0 %v688_v4  ;;  %v689_v8 = vcombine.high %v687_v5, %v687_v5  ;;  %v706_v9 = vcombine.high %v704_v7, %v704_v7  ;;  %v741_v30 = vcombine.high %v405_v25, %v405_v25  ;;  %v2531_v32 = vrot.slane %v410_v31, %v2499_v58  ;;  %v2229_v3 = vld [vmem:[%s2494_s6 + $0x54] ss:$196 sps:$4 sm:$0xff]   ;;  %v408_v4 = vld [vmem:[%s2506_s12 + $0x38] sm:$0xff] }
  0x40   : > { %934 = vmatpush1.bf16.xpose.msra.mxu0 %v680_v63  ;;  %v723_v19 = vcombine.high %v721_v14, %v721_v14  ;;  %v740_v29 = vcombine.high %v738_v23, %v738_v23  ;;  %v826_v33 = vcombine.high %v410_v31, %v410_v31  ;;  %v748_v34 = vrot.slane %v405_v25, %v2499_v58  ;;  %v2230_v15 = vld [vmem:[%s2494_s6 + $0x58] ss:$196 sps:$4 sm:$0xff]   ;;  %v2253_v31 = vld [vmem:[%s2494_s6 + $0x8c] ss:$196 sps:$4 sm:$0xff]  }
  0x41   : > { %974 = vmatprep.subr.bf16.mxu1 %v689_v8  ;;  %1015 = vmatprep.subr.bf16.mxu0 %v705_v6  ;;  %v755_v39 = vrot.slane %v741_v30, %v2499_v58  ;;  %v2542_v40 = vrot.slane %v411_v37, %v2499_v58  ;;  %v843_v41 = vcombine.high %v411_v37, %v411_v37  ;;  %v2251_v37 = vld [vmem:[%s2494_s6 + $0x88] ss:$196 sps:$4 sm:$0xff]  }
  0x42   : > { %975 = vmatpush1.bf16.xpose.msra.mxu1 %v687_v5  ;;  %v2536_v36 = vrot.slane %v826_v33, %v2499_v58  ;;  %v756_v44 = vcombine.high %v748_v34, %v748_v34  ;;  %v2552_v48 = vrot.slane %v412_v46, %v2499_v58  ;;  %v860_v49 = vcombine.high %v412_v46, %v412_v46  ;;  %v2223_v5 = vld [vmem:[%s2494_s6 + $0x48] ss:$196 sps:$4 sm:$0xff]  }
  0x43   : > { %1056 = vmatprep.subr.bf16.mxu1 %v706_v9  ;;  %v2547_v45 = vrot.slane %v843_v41, %v2499_v58  ;;  %v757_v50 = vcombine.high %v755_v39, %v755_v39  ;;  %v758_v51 = vcombine.high %v406_v42, %v406_v42  ;;  %v765_v53 = vrot.slane %v406_v42, %v2499_v58  ;;  %v2255_v42 = vld [vmem:[%s2494_s6 + $0x90] ss:$196 sps:$4 sm:$0xff]  }
  0x44   : > { %v2555_v52 = vrot.slane %v860_v49, %v2499_v58  ;;  %v775_v63 = vcombine.high %v407_v57, %v407_v57  ;;  %v782_v0 = vrot.slane %v407_v57, %v2499_v58  ;;  %v792_v9 = vcombine.high %v408_v4, %v408_v4  ;;  %v2271_v49 = vld [vmem:[%s2494_s6 + $0xb4] ss:$196 sps:$4 sm:$0xff]  }
  0x45   : > { %v772_v55 = vrot.slane %v758_v51, %v2499_v58  ;;  %v773_v60 = vcombine.high %v765_v53, %v765_v53  ;;  %v799_v10 = vrot.slane %v408_v4, %v2499_v58  ;;  %v841_v30 = vcombine.high %v2531_v32, %v2531_v32  ;;  %v2274_v51 = vld [vmem:[%s2494_s6 + $0xbc] ss:$196 sps:$4 sm:$0xff]  }
  0x46   : > { %v789_v2 = vrot.slane %v775_v63, %v2499_v58  ;;  %v790_v6 = vcombine.high %v782_v0, %v782_v0  ;;  %v842_v33 = vcombine.high %v2536_v36, %v2536_v36  ;;  %v859_v41 = vcombine.high %v2547_v45, %v2547_v45 }
  0x47   : > { %966 = vmatmul.mubr.bf16.vlgmr.msra.gmra.mrb[0].mxu0 %v2192_v12  ;;  %v774_v62 = vcombine.high %v772_v55, %v772_v55  ;;  %v806_v12 = vrot.slane %v792_v9, %v2499_v58  ;;  %v875_v46 = vcombine.high %v2552_v48, %v2552_v48 }
  0x48   : > { %1016 = vmatpush1.bf16.xpose.msra.mxu0 %v697_v1  ;;  %1047 = vmatprep.mubr.bf16.mxu0 %v2201_v13  ;;  %v2220_v1 = vld [vmem:[%s2494_s6 + $0x40] ss:$196 sps:$4 sm:$0xff]   ;;  %v791_v8 = vcombine.high %v789_v2, %v789_v2 }
  0x49   : > { %1007 = vmatmul.mubr.bf16.vlgmr.msra.gmra.mrb[0].mxu1 %v2195_v16  ;;  %1097 = vmatprep.subr.bf16.mxu0 %v722_v17  ;;  %v2236_v13 = vld [vmem:[%s2494_s6 + $0x64] ss:$196 sps:$4 sm:$0xff]   ;;  %v807_v16 = vcombine.high %v799_v10, %v799_v10  ;;  %v2239_v17 = vld [vmem:[%s2494_s6 + $0x6c] ss:$196 sps:$4 sm:$0xff]  }
  0x4a   : > { %1057 = vmatpush1.bf16.xpose.msra.mxu1 %v704_v7  ;;  %1088 = vmatprep.mubr.bf16.mxu1 %v2204_v18  ;;  %v2232_v7 = vld [vmem:[%s2494_s6 + $0x5c] ss:$196 sps:$4 sm:$0xff]   ;;  %v808_v18 = vcombine.high %v806_v12, %v806_v12 }
  0x4b   : > { %1138 = vmatprep.subr.bf16.mxu1 %v723_v19 }
  0x4f   : > { %1048 = vmatmul.mubr.bf16.vlgmr.msra.gmra.mrb[4].mxu0 %v2199_v22 }
  0x50   : > { %1098 = vmatpush1.bf16.xpose.msra.mxu0 %v714_v11  ;;  %1129 = vmatprep.mubr.bf16.mxu0 %v2208_v24  ;;  %v2227_v11 = vld [vmem:[%s2494_s6 + $0x50] ss:$196 sps:$4 sm:$0xff]   ;;  %v2237_v24 = vld [vmem:[%s2494_s6 + $0x68] ss:$196 sps:$4 sm:$0xff]  }
  0x51   : > { %1089 = vmatmul.mubr.bf16.vlgmr.msra.gmra.mrb[4].mxu1 %v2202_v26  ;;  %1179 = vmatprep.subr.bf16.mxu0 %v739_v27  ;;  %v2246_v26 = vld [vmem:[%s2494_s6 + $0x7c] ss:$196 sps:$4 sm:$0xff]  }
  0x52   : > { %1139 = vmatpush1.bf16.xpose.msra.mxu1 %v721_v14  ;;  %1170 = vmatprep.mubr.bf16.mxu1 %v2211_v28  ;;  %v409_v14 = vld [vmem:[%s2506_s12 + $0x40] sm:$0xff] }
  0x53   : > { %1220 = vmatprep.subr.bf16.mxu1 %v740_v29  ;;  %v809_v19 = vcombine.high %v409_v14, %v409_v14  ;;  %v816_v20 = vrot.slane %v409_v14, %v2499_v58  ;;  %v2241_v28 = vld [vmem:[%s2494_s6 + $0x70] ss:$196 sps:$4 sm:$0xff]   ;;  %v2244_v29 = vld [vmem:[%s2494_s6 + $0x78] ss:$196 sps:$4 sm:$0xff]  }
  0x55   : > { %v823_v22 = vrot.slane %v809_v19, %v2499_v58  ;;  %v824_v25 = vcombine.high %v816_v20, %v816_v20  ;;  %v2250_v58 = vld [vmem:[%s2494_s6 + $0x84] ss:$196 sps:$4 sm:$0xff]  }
  0x57   : > { %1130 = vmatmul.mubr.bf16.vlgmr.msra.gmra.mrb[8].mxu0 %v2206_v35  ;;  %v825_v27 = vcombine.high %v823_v22, %v823_v22  ;;  %v2257_v35 = vld [vmem:[%s2494_s6 + $0x94] ss:$196 sps:$4 sm:$0xff]  }
  0x58   : > { %1180 = vmatpush1.bf16.xpose.msra.mxu0 %v731_v21  ;;  %1211 = vmatprep.mubr.bf16.mxu0 %v2215_v38  ;;  %v2234_v21 = vld [vmem:[%s2494_s6 + $0x60] ss:$196 sps:$4 sm:$0xff]   ;;  %v858_v38 = vcombine.high %v2542_v40, %v2542_v40 }
  0x59   : > { %1171 = vmatmul.mubr.bf16.vlgmr.msra.gmra.mrb[8].mxu1 %v2209_v43  ;;  %1261 = vmatprep.subr.bf16.mxu0 %v756_v44  ;;  %v2264_v43 = vld [vmem:[%s2494_s6 + $0xa4] ss:$196 sps:$4 sm:$0xff]   ;;  %v2258_v44 = vld [vmem:[%s2494_s6 + $0x98] ss:$196 sps:$4 sm:$0xff]  }
  0x5a   : > { %1221 = vmatpush1.bf16.xpose.msra.mxu1 %v738_v23  ;;  %1252 = vmatprep.mubr.bf16.mxu1 %v2218_v47  ;;  %v2243_v23 = vld [vmem:[%s2494_s6 + $0x74] ss:$196 sps:$4 sm:$0xff]   ;;  %v2267_v47 = vld [vmem:[%s2494_s6 + $0xac] ss:$196 sps:$4 sm:$0xff]  }
  0x5b   : > { %1302 = vmatprep.subr.bf16.mxu1 %v757_v50  ;;  %v2265_v50 = vld [vmem:[%s2494_s6 + $0xa8] ss:$196 sps:$4 sm:$0xff]  }
  0x5f   : > { %1212 = vmatmul.mubr.bf16.vlgmr.msra.gmra.mrb[12].mxu0 %v2213_v54  ;;  %v2132_v54 = vld.sshfl [vmem:[%s2506_s12 + $0x60] sm:$0x3 pattern:$0x76325410] }
  0x60   : > { %1262 = vmatpush1.bf16.xpose.msra.mxu0 %v748_v34  ;;  %1293 = vmatprep.mubr.bf16.mxu0 %v2222_v56  ;;  %v2248_v34 = vld [vmem:[%s2494_s6 + $0x80] ss:$196 sps:$4 sm:$0xff]  }
  0x61   : > { %1253 = vmatmul.mubr.bf16.vlgmr.msra.gmra.mrb[12].mxu1 %v2216_v59  ;;  %1343 = vmatprep.subr.bf16.mxu0 %v773_v60 }
  0x62   : > { %1303 = vmatpush1.bf16.xpose.msra.mxu1 %v755_v39  ;;  %1334 = vmatprep.mubr.bf16.mxu1 %v2225_v61  ;;  %v2260_v39 = vld [vmem:[%s2494_s6 + $0x9c] ss:$196 sps:$4 sm:$0xff]  }
  0x63   : > { %1384 = vmatprep.subr.bf16.mxu1 %v774_v62 }
  0x67   : > { %1294 = vmatmul.mubr.bf16.vlgmr.msra.gmra.mrb[16].mxu0 %v2220_v1 }
  0x68   : > { %1344 = vmatpush1.bf16.xpose.msra.mxu0 %v765_v53  ;;  %1375 = vmatprep.mubr.bf16.mxu0 %v2229_v3  ;;  %v2272_v53 = vld [vmem:[%s2494_s6 + $0xb8] ss:$196 sps:$4 sm:$0xff]  }
  0x69   : > { %1335 = vmatmul.mubr.bf16.vlgmr.msra.gmra.mrb[16].mxu1 %v2223_v5  ;;  %1425 = vmatprep.subr.bf16.mxu0 %v790_v6 }
  0x6a   : > { %1385 = vmatpush1.bf16.xpose.msra.mxu1 %v772_v55  ;;  %1416 = vmatprep.mubr.bf16.mxu1 %v2232_v7  ;;  %v2275_v55 = vld [vmem:[%s2494_s6 + $0xc0] ss:$196 sps:$4 sm:$0xff]  }
  0x6b   : > { %1466 = vmatprep.subr.bf16.mxu1 %v791_v8 }
  0x6f   : > { %1376 = vmatmul.mubr.bf16.vlgmr.msra.gmra.mrb[20].mxu0 %v2227_v11 }
  0x70   : > { %1426 = vmatpush1.bf16.xpose.msra.mxu0 %v782_v0  ;;  %1457 = vmatprep.mubr.bf16.mxu0 %v2236_v13 }
  0x71   : > { %1417 = vmatmul.mubr.bf16.vlgmr.msra.gmra.mrb[20].mxu1 %v2230_v15  ;;  %1507 = vmatprep.subr.bf16.mxu0 %v807_v16 }
  0x72   : > { %1467 = vmatpush1.bf16.xpose.msra.mxu1 %v789_v2  ;;  %1498 = vmatprep.mubr.bf16.mxu1 %v2239_v17 }
  0x73   : > { %1548 = vmatprep.subr.bf16.mxu1 %v808_v18 }
  0x77   : > { %1458 = vmatmul.mubr.bf16.vlgmr.msra.gmra.mrb[24].mxu0 %v2234_v21 }
  0x78   : > { %1508 = vmatpush1.bf16.xpose.msra.mxu0 %v799_v10  ;;  %1539 = vmatprep.mubr.bf16.mxu0 %v2243_v23 }
  0x79   : > { %1499 = vmatmul.mubr.bf16.vlgmr.msra.gmra.mrb[24].mxu1 %v2237_v24  ;;  %1589 = vmatprep.subr.bf16.mxu0 %v824_v25 }
  0x7a   : > { %1549 = vmatpush1.bf16.xpose.msra.mxu1 %v806_v12  ;;  %1580 = vmatprep.mubr.bf16.mxu1 %v2246_v26 }
  0x7b   : > { %1630 = vmatprep.subr.bf16.mxu1 %v825_v27 }
  0x7f   : > { %1540 = vmatmul.mubr.bf16.vlgmr.msra.gmra.mrb[28].mxu0 %v2241_v28 }
  0x80   : > { %1590 = vmatpush1.bf16.xpose.msra.mxu0 %v816_v20  ;;  %1621 = vmatprep.mubr.bf16.mxu0 %v2250_v58 }
  0x81   : > { %1581 = vmatmul.mubr.bf16.vlgmr.msra.gmra.mrb[28].mxu1 %v2244_v29  ;;  %1671 = vmatprep.subr.bf16.mxu0 %v841_v30 }
  0x82   : > { %1631 = vmatpush1.bf16.xpose.msra.mxu1 %v823_v22  ;;  %1662 = vmatprep.mubr.bf16.mxu1 %v2253_v31 }
  0x83   : > { %1712 = vmatprep.subr.bf16.mxu1 %v842_v33 }
  0x87   : > { %1622 = vmatmul.mubr.bf16.vlgmr.msra.gmra.mrb[32].mxu0 %v2248_v34 }
  0x88   : > { %1672 = vmatpush1.bf16.xpose.msra.mxu0 %v2531_v32  ;;  %1703 = vmatprep.mubr.bf16.mxu0 %v2257_v35  ;;  %v876_v32 = vcombine.high %v2555_v52, %v2555_v52 }
  0x89   : > { %1663 = vmatmul.mubr.bf16.vlgmr.msra.gmra.mrb[32].mxu1 %v2251_v37  ;;  %1753 = vmatprep.subr.bf16.mxu0 %v858_v38 }
  0x8a   : > { %1713 = vmatpush1.bf16.xpose.msra.mxu1 %v2536_v36  ;;  %1744 = vmatprep.mubr.bf16.mxu1 %v2260_v39  ;;  %v2262_v36 = vld [vmem:[%s2494_s6 + $0xa0] ss:$196 sps:$4 sm:$0xff]  }
  0x8b   : > { %1794 = vmatprep.subr.bf16.mxu1 %v859_v41 }
  0x8f   : > { %1704 = vmatmul.mubr.bf16.vlgmr.msra.gmra.mrb[36].mxu0 %v2255_v42 }
  0x90   : > { %1754 = vmatpush1.bf16.xpose.msra.mxu0 %v2542_v40  ;;  %1785 = vmatprep.mubr.bf16.mxu0 %v2264_v43  ;;  %v2318_v40 = vmov 0.0  }
  0x91   : > { %1745 = vmatmul.mubr.bf16.vlgmr.msra.gmra.mrb[36].mxu1 %v2258_v44  ;;  %1835 = vmatprep.subr.bf16.mxu0 %v875_v46  ;;  %346 = vst.msk [vmem:[#allocation2] sm:$0xff] %vm345_vm1, %v2318_v40 }
  0x92   : > { %1795 = vmatpush1.bf16.xpose.msra.mxu1 %v2547_v45  ;;  %1826 = vmatprep.mubr.bf16.mxu1 %v2267_v47  ;;  %v2269_v45 = vld [vmem:[%s2494_s6 + $0xb0] ss:$196 sps:$4 sm:$0xff]   ;;  %348 = vst.msk [vmem:[#allocation2 + $0x8] sm:$0x7f] %vm347_vm2, %v2318_v40 }
  0x93   : > { %1876 = vmatprep.subr.bf16.mxu1 %v876_v32 }
  0x97   : > { %1786 = vmatmul.mubr.bf16.vlgmr.msra.gmra.mrb[40].mxu0 %v2262_v36 }
  0x98   : > { %1836 = vmatpush1.bf16.xpose.msra.mxu0 %v2552_v48  ;;  %1867 = vmatprep.mubr.bf16.mxu0 %v2271_v49 }
  0x99   : > { %1827 = vmatmul.mubr.bf16.vlgmr.msra.gmra.mrb[40].mxu1 %v2265_v50  ;;  %2138 = vmatprep.subr.bf16.mxu0 %v2318_v40 }
  0x9a   : > { %1877 = vmatpush1.bf16.xpose.msra.mxu1 %v2555_v52  ;;  %1908 = vmatprep.mubr.bf16.mxu1 %v2274_v51 }
  0x9f   : > { %1868 = vmatmul.mubr.bf16.vlgmr.msra.gmra.mrb[44].mxu0 %v2269_v45 }
  0xa0   : > { %2139 = vmatpush3.bf16.xpose.msra.mxu0 %v2132_v54  ;;  %2140 = vmatprep.mubr.msk.bf16.mxu0 %vm2319_vm0, %v2318_v40 }
  0xa1   : > { %1909 = vmatmul.mubr.bf16.vlgmr.msra.gmra.mrb[44].mxu1 %v2272_v53 }
  0xa7   : > { %2141 = vmatmul.mubr.bf16.vlgmr.msra.gmra.mrb[48].mxu0 %v2275_v55 }
 0x11a   : > { %v967_v48 = vpop.f32.mrb[0].mxu0 }
 0x11b   : > { %v969_v56 = vpop.f32.mrb[1].mxu0 }
 0x11c   : > { %v970_v52 = vpop.f32.mrb[2].mxu0  ;;  %v1008_v57 = vpop.f32.mrb[0].mxu1 }
 0x11d   : > { %v1009_v59 = vadd.f32 %v1008_v57, %v967_v48  ;;  %v972_v60 = vpop.f32.mrb[3].mxu0  ;;  %v1010_v61 = vpop.f32.mrb[1].mxu1 }
 0x11e   : > { %v1011_v62 = vpop.f32.mrb[2].mxu1 }
 0x11f   : > { %v1012_v63 = vadd.f32 %v1011_v62, %v970_v52  ;;  %v1013_v0 = vpop.f32.mrb[3].mxu1 }
 0x122   : > { %v1049_v1 = vpop.f32.mrb[4].mxu0 }
 0x123   : > { %v1050_v2 = vadd.f32 %v1049_v1, %v1009_v59  ;;  %v1051_v3 = vpop.f32.mrb[5].mxu0 }
 0x124   : > { %v1052_v4 = vpop.f32.mrb[6].mxu0  ;;  %v1090_v5 = vpop.f32.mrb[4].mxu1 }
 0x125   : > { %v1053_v6 = vadd.f32 %v1052_v4, %v1012_v63  ;;  %v1091_v7 = vadd.f32 %v1090_v5, %v1050_v2  ;;  %v1054_v8 = vpop.f32.mrb[7].mxu0  ;;  %v1092_v9 = vpop.f32.mrb[5].mxu1 }
 0x126   : > { %v1093_v10 = vpop.f32.mrb[6].mxu1 }
 0x127   : > { %v1094_v11 = vadd.f32 %v1093_v10, %v1053_v6  ;;  %v1095_v12 = vpop.f32.mrb[7].mxu1 }
 0x12a   : > { %v1131_v13 = vpop.f32.mrb[8].mxu0 }
 0x12b   : > { %v1132_v14 = vadd.f32 %v1131_v13, %v1091_v7  ;;  %v1133_v15 = vpop.f32.mrb[9].mxu0 }
 0x12c   : > { %v1134_v16 = vpop.f32.mrb[10].mxu0  ;;  %v1172_v17 = vpop.f32.mrb[8].mxu1 }
 0x12d   : > { %v1135_v18 = vadd.f32 %v1134_v16, %v1094_v11  ;;  %v1173_v19 = vadd.f32 %v1172_v17, %v1132_v14  ;;  %v1136_v20 = vpop.f32.mrb[11].mxu0  ;;  %v1174_v21 = vpop.f32.mrb[9].mxu1 }
 0x12e   : > { %v1175_v22 = vpop.f32.mrb[10].mxu1 }
 0x12f   : > { %v1176_v23 = vadd.f32 %v1175_v22, %v1135_v18  ;;  %v1177_v24 = vpop.f32.mrb[11].mxu1 }
 0x132   : > { %v1213_v25 = vpop.f32.mrb[12].mxu0 }
 0x133   : > { %v1214_v26 = vadd.f32 %v1213_v25, %v1173_v19  ;;  %v1215_v27 = vpop.f32.mrb[13].mxu0 }
 0x134   : > { %v1216_v28 = vpop.f32.mrb[14].mxu0  ;;  %v1254_v58 = vpop.f32.mrb[12].mxu1 }
 0x135   : > { %v1217_v29 = vadd.f32 %v1216_v28, %v1176_v23  ;;  %v1255_v30 = vadd.f32 %v1254_v58, %v1214_v26  ;;  %v1218_v31 = vpop.f32.mrb[15].mxu0  ;;  %v1256_v33 = vpop.f32.mrb[13].mxu1 }
 0x136   : > { %v1257_v34 = vpop.f32.mrb[14].mxu1 }
 0x137   : > { %v1258_v35 = vadd.f32 %v1257_v34, %v1217_v29  ;;  %v1259_v37 = vpop.f32.mrb[15].mxu1 }
 0x13a   : > { %v1295_v38 = vpop.f32.mrb[16].mxu0 }
 0x13b   : > { %v1296_v39 = vadd.f32 %v1295_v38, %v1255_v30  ;;  %v1297_v41 = vpop.f32.mrb[17].mxu0 }
 0x13c   : > { %v1298_v42 = vpop.f32.mrb[18].mxu0  ;;  %v1336_v43 = vpop.f32.mrb[16].mxu1 }
 0x13d   : > { %v1299_v44 = vadd.f32 %v1298_v42, %v1258_v35  ;;  %v1337_v46 = vadd.f32 %v1336_v43, %v1296_v39  ;;  %v1300_v47 = vpop.f32.mrb[19].mxu0  ;;  %v1338_v32 = vpop.f32.mrb[17].mxu1 }
 0x13e   : > { %v1339_v36 = vpop.f32.mrb[18].mxu1 }
 0x13f   : > { %v1340_v49 = vadd.f32 %v1339_v36, %v1299_v44  ;;  %v1341_v50 = vpop.f32.mrb[19].mxu1 }
 0x142   : > { %v1377_v51 = vpop.f32.mrb[20].mxu0 }
 0x143   : > { %v1378_v40 = vadd.f32 %v1377_v51, %v1337_v46  ;;  %v1379_v45 = vpop.f32.mrb[21].mxu0 }
 0x144   : > { %v1380_v53 = vpop.f32.mrb[22].mxu0  ;;  %v1418_v54 = vpop.f32.mrb[20].mxu1 }
 0x145   : > { %v1381_v55 = vadd.f32 %v1380_v53, %v1340_v49  ;;  %v1419_v48 = vadd.f32 %v1418_v54, %v1378_v40  ;;  %v1382_v56 = vpop.f32.mrb[23].mxu0  ;;  %v1420_v52 = vpop.f32.mrb[21].mxu1 }
 0x146   : > { %v1421_v57 = vpop.f32.mrb[22].mxu1 }
 0x147   : > { %v1422_v59 = vadd.f32 %v1421_v57, %v1381_v55  ;;  %v1423_v60 = vpop.f32.mrb[23].mxu1 }
 0x14a   : > { %v1459_v61 = vpop.f32.mrb[24].mxu0 }
 0x14b   : > { %v1460_v62 = vadd.f32 %v1459_v61, %v1419_v48  ;;  %v1461_v63 = vpop.f32.mrb[25].mxu0 }
 0x14c   : > { %v1462_v0 = vpop.f32.mrb[26].mxu0  ;;  %v1500_v1 = vpop.f32.mrb[24].mxu1 }
 0x14d   : > { %v1463_v2 = vadd.f32 %v1462_v0, %v1422_v59  ;;  %v1501_v3 = vadd.f32 %v1500_v1, %v1460_v62  ;;  %v1464_v4 = vpop.f32.mrb[27].mxu0  ;;  %v1502_v5 = vpop.f32.mrb[25].mxu1 }
 0x14e   : > { %v1503_v6 = vpop.f32.mrb[26].mxu1  ;;  %v349_v5 = vld [vmem:[#allocation2] sm:$0xff] }
 0x14f   : > { %v1504_v7 = vadd.f32 %v1503_v6, %v1463_v2  ;;  %v1505_v8 = vpop.f32.mrb[27].mxu1 }
 0x152   : > { %v1541_v9 = vpop.f32.mrb[28].mxu0 }
 0x153   : > { %v1542_v10 = vadd.f32 %v1541_v9, %v1501_v3  ;;  %v1543_v11 = vpop.f32.mrb[29].mxu0  ;;  %v350_v9 = vld [vmem:[#allocation2 + $0x8] sm:$0x7f] }
 0x154   : > { %v1544_v12 = vpop.f32.mrb[30].mxu0  ;;  %v1582_v13 = vpop.f32.mrb[28].mxu1 }
 0x155   : > { %v1545_v14 = vadd.f32 %v1544_v12, %v1504_v7  ;;  %v1583_v15 = vadd.f32 %v1582_v13, %v1542_v10  ;;  %v1546_v16 = vpop.f32.mrb[31].mxu0  ;;  %v1584_v17 = vpop.f32.mrb[29].mxu1 }
 0x156   : > { %v1585_v18 = vpop.f32.mrb[30].mxu1 }
 0x157   : > { %v1586_v19 = vadd.f32 %v1585_v18, %v1545_v14  ;;  %v1587_v20 = vpop.f32.mrb[31].mxu1 }
 0x15a   : > { %v1623_v21 = vpop.f32.mrb[32].mxu0 }
 0x15b   : > { %v1624_v22 = vadd.f32 %v1623_v21, %v1583_v15  ;;  %v1625_v23 = vpop.f32.mrb[33].mxu0  ;;  %v1974_v15 = vpop.permute.xlu0 %1973 }
 0x15c   : > { %v1626_v24 = vpop.f32.mrb[34].mxu0  ;;  %v1664_v25 = vpop.f32.mrb[32].mxu1 }
 0x15d   : > { %v1627_v26 = vadd.f32 %v1626_v24, %v1586_v19  ;;  %v1665_v27 = vadd.f32 %v1664_v25, %v1624_v22  ;;  %v1628_v28 = vpop.f32.mrb[35].mxu0  ;;  %v1666_v58 = vpop.f32.mrb[33].mxu1 }
 0x15e   : > { %v1667_v29 = vpop.f32.mrb[34].mxu1 }
 0x15f   : > { %v1668_v30 = vadd.f32 %v1667_v29, %v1627_v26  ;;  %v1669_v31 = vpop.f32.mrb[35].mxu1  ;;  %v1979_v18 = vpop.permute.xlu0 %1978 }
 0x162   : > { %v1705_v33 = vpop.f32.mrb[36].mxu0 }
 0x163   : > { %v1706_v34 = vadd.f32 %v1705_v33, %v1665_v27  ;;  %v1707_v35 = vpop.f32.mrb[37].mxu0 }
 0x164   : > { %v1708_v37 = vpop.f32.mrb[38].mxu0  ;;  %v1746_v38 = vpop.f32.mrb[36].mxu1 }
 0x165   : > { %v1709_v39 = vadd.f32 %v1708_v37, %v1668_v30  ;;  %v1747_v41 = vadd.f32 %v1746_v38, %v1706_v34  ;;  %v1710_v42 = vpop.f32.mrb[39].mxu0  ;;  %v1748_v43 = vpop.f32.mrb[37].mxu1 }
 0x166   : > { %v1749_v44 = vpop.f32.mrb[38].mxu1 }
 0x167   : > { %v1750_v46 = vadd.f32 %v1749_v44, %v1709_v39  ;;  %v1751_v47 = vpop.f32.mrb[39].mxu1 }
 0x16a   : > { %v1787_v32 = vpop.f32.mrb[40].mxu0 }
 0x16b   : > { %v1788_v36 = vadd.f32 %v1787_v32, %v1747_v41  ;;  %v1789_v49 = vpop.f32.mrb[41].mxu0 }
 0x16c   : > { %v1790_v50 = vpop.f32.mrb[42].mxu0  ;;  %v1828_v51 = vpop.f32.mrb[40].mxu1 }
 0x16d   : > { %v1791_v40 = vadd.f32 %v1790_v50, %v1750_v46  ;;  %v1829_v45 = vadd.f32 %v1828_v51, %v1788_v36  ;;  %v1792_v53 = vpop.f32.mrb[43].mxu0  ;;  %v1830_v54 = vpop.f32.mrb[41].mxu1 }
 0x16e   : > { %v1831_v55 = vpop.f32.mrb[42].mxu1 }
 0x16f   : > { %v1832_v48 = vadd.f32 %v1831_v55, %v1791_v40  ;;  %v1833_v56 = vpop.f32.mrb[43].mxu1 }
 0x172   : > { %v1869_v52 = vpop.f32.mrb[44].mxu0 }
 0x173   : > { %v1870_v57 = vadd.f32 %v1869_v52, %v1829_v45  ;;  %v1871_v59 = vpop.f32.mrb[45].mxu0 }
 0x174   : > { %v1872_v60 = vpop.f32.mrb[46].mxu0  ;;  %v1910_v61 = vpop.f32.mrb[44].mxu1 }
 0x175   : > { %v1873_v62 = vadd.f32 %v1872_v60, %v1832_v48  ;;  %v1911_v63 = vadd.f32 %v1910_v61, %v1870_v57  ;;  %v1874_v0 = vpop.f32.mrb[47].mxu0  ;;  %v1912_v1 = vpop.f32.mrb[45].mxu1 }
 0x176   : > { %v1913_v2 = vpop.f32.mrb[46].mxu1 }
 0x177   : > { %v1914_v3 = vadd.f32 %v1913_v2, %v1873_v62  ;;  %v1915_v4 = vpop.f32.mrb[47].mxu1 }
 0x17a   : > { %v1951_v6 = vpop.f32.mrb[48].mxu0 }
 0x17b   : > { %v1952_v7 = vadd.f32 %v1951_v6, %v1911_v63  ;;  %v2142_v8 = vpop.f32.mrb[49].mxu0 }
 0x17c   : > { %v1954_v10 = vpop.f32.mrb[50].mxu0 }
 0x17d   : > { %v1958_v11 = vadd.f32 %v1952_v7, %v349_v5  ;;  %v1955_v12 = vadd.f32 %v1954_v10, %v1914_v3  ;;  %v2143_v13 = vpop.f32.mrb[51].mxu0 }
 0x17f   : > { %1961 = vst.msk [vmem:[#allocation2] sm:$0xff] %vm345_vm1, %v1958_v11  ;;  %v1959_v14 = vadd.f32 %v1955_v12, %v350_v9 }
 0x181   : > { %1963 = vst.msk [vmem:[#allocation2 + $0x8] sm:$0x7f] %vm347_vm2, %v1959_v14 }
 0x186   : > { %v1969_v16 = vld [vmem:[#allocation2] sm:$0xff] }
 0x187   : > { %v1981_v17 = vmul.f32 %v1974_v15, %v1969_v16 }
 0x188   : > { %v1970_v19 = vld [vmem:[#allocation2 + $0x8] sm:$0x7f] }
 0x189   : > { %v1982_v20 = vmul.f32 %v1979_v18, %v1970_v19  ;;  %v1983_v21 = vsel %vm345_vm1, %v1981_v17, 0.0 }
 0x18b   : > { %v1984_v22 = vsel %vm347_vm2, %v1982_v20, 0.0 }
 0x18c   : > { %v1985_v23 = vadd.f32 %v1984_v22, %v1983_v21 }
 0x18e   : > { %v1986_v24 = vrot.slane %v1985_v23, 4 }
 0x190   : > { %v1987_v25 = vadd.f32 %v1986_v24, %v1985_v23 }
 0x192   : > { %v1988_v26 = vrot.slane %v1987_v25, 2 }
 0x194   : > { %v1989_v27 = vadd.f32 %v1988_v26, %v1987_v25 }
 0x196   : > { %v1990_v28 = vrot.slane %v1989_v27, 1 }
 0x198   : > { %v1991_v58 = vadd.f32 %v1990_v28, %v1989_v27 }
 0x19a   : > { %1993 = vst.msk [vmem:[%s339_s21] sm:$0x1] %vm1992_vm3, %v1991_v58 }
 0x19b PF: > { %s13_s16 = sadd.s32 1, %s2314_s16   ;;  %s2652_s12 = smov %s2302_s13 }
 0x19c   : > { %p10_p11 = scmp.ge.s32.totalorder %s13_s16, 4   ;;  %s2653_s13 = smov %s2375_s20 }
 0x19d   : > { %s2654_s14 = smov %s2310_s15  ;;  %s2655_s15 = smov %s2657_s17 }
 0x19e   :  { %12 = sbr.rel (!%p10_p11) target bundleno = 3 (0x3), region = 110 }

</bundles_post_ra>
